<compile_context>
chip_gen: v6e
topology: v6e:2x2x1
jax: 0.10.0
libtpu: 0.0.40
codegen_flags: <defaults>
</compile_context>

<pallas_src>
import math
import functools

import jax
import jax.numpy as jnp
from jax import lax
from jax.experimental import pallas as pl
from jax.experimental.pallas import tpu as pltpu

LANES = 128
# Explicit scoped-VMEM budget: above v5e's 16 MiB default, equal to v6e/v7x defaults, and well
# inside v7x's 64 MiB physical VMEM so the chosen tiles keep double-buffering intact everywhere.
_VMEM_LIMIT = 32 * 1024 * 1024


def _pick_tile(dim, prefs):
    """Largest preferred tile that divides `dim`, else the full dim."""
    for p in prefs:
        if dim >= p and dim % p == 0:
            return p
    return dim


def _lane_match(x, n):
    """x: (..., LANES) lane-replicated stat -> (..., n) for broadcasting against n-lane tiles."""
    l = x.shape[-1]
    if n == l:
        return x
    if n < l:
        return x[..., :n]
    assert n % l == 0
    return jnp.tile(x, (1,) * (x.ndim - 1) + (n // l,))


# ----------------------------------------------------------------------------
# Pallas kernel 1: tiled linear layer  out = x @ W + b
#   grid (M/tm, N/tn, K/tk), K innermost ("arbitrary"), f32 VMEM accumulator,
#   bias folded into the accumulator init (no epilogue broadcast + add).
# ----------------------------------------------------------------------------
def _linear_kernel(x_ref, w_ref, b_ref, o_ref, acc_ref):
    @pl.when(pl.program_id(2) == 0)
    def _init():
        acc_ref[...] = jnp.broadcast_to(b_ref[...].astype(jnp.float32), acc_ref.shape)

    acc_ref[...] += jnp.dot(x_ref[...], w_ref[...],
                            preferred_element_type=jnp.float32)

    @pl.when(pl.program_id(2) == pl.num_programs(2) - 1)
    def _finalize():
        o_ref[...] = acc_ref[...].astype(o_ref.dtype)


def linear_pallas(x, w, b):
    """x: (M, K), w: (K, N), b: (1, N) -> (M, N)."""
    M, K = x.shape
    Kw, N = w.shape
    assert K == Kw
    pad = (-M) % 8
    if pad:
        x = jnp.pad(x, ((0, pad), (0, 0)))
    Mp = M + pad

    # 128-multiple tiles fill v5e's 4x128 MXU natively and stay modest on v7x's 64 MiB VMEM.
    tm = _pick_tile(Mp, (256, 128, 64, 32, 16, 8))
    tn = _pick_tile(N, (256, 128))
    tk = _pick_tile(K, (512, 256, 128))

    out = pl.pallas_call(
        _linear_kernel,
        out_shape=jax.ShapeDtypeStruct((Mp, N), x.dtype),
        grid_spec=pltpu.PrefetchScalarGridSpec(
            num_scalar_prefetch=0,
            grid=(Mp // tm, N // tn, K // tk),
            in_specs=[
                pl.BlockSpec((tm, tk), lambda i, j, k: (i, k)),
                pl.BlockSpec((tk, tn), lambda i, j, k: (k, j)),
                pl.BlockSpec((1, tn), lambda i, j, k: (0, j)),
            ],
            out_specs=pl.BlockSpec((tm, tn), lambda i, j, k: (i, j)),
            scratch_shapes=[pltpu.VMEM((tm, tn), jnp.float32)],
        ),
        compiler_params=pltpu.CompilerParams(
            dimension_semantics=("parallel", "parallel", "arbitrary"),
            vmem_limit_bytes=_VMEM_LIMIT),
    )(x, w, b)
    return out[:M] if pad else out


# ----------------------------------------------------------------------------
# Pallas kernel 2: RoPE + scale + head-major split prepass (run ONCE per token).
#   qkv (b, s, 3, h, d) -> q, k, v (b, h, s, d); RoPE applied to q/k, softmax_scale
#   folded into q, optional bf16 output for the attention MXU (v6e/v7x).
#   This hoists all q/k-side RoPE, the softmax scaling, and the head-major
#   transpose out of the attention KV inner loop.
# ----------------------------------------------------------------------------
def _rotate_half(x, c, s, rotary_dim):
    """Rotate-half RoPE with sign-folded sin table: out = x*c + roll(x, rd/2)*s."""
    d = x.shape[-1]
    r2 = rotary_dim // 2
    if rotary_dim == d and d % LANES == 0:
        # XLU lane rotation (free slot); roll by d/2 == concat([x2, x1]); sign folded into `s`.
        return x * c + pltpu.roll(x, shift=r2, axis=-1) * s
    # Fallback for sub-128 / partial rotary dims: explicit slices + concat (one-time prepass,
    # so the relayout cost is amortized over the whole attention KV sweep).
    x1 = x[..., :r2]
    x2 = x[..., r2:rotary_dim]
    rolled = jnp.concatenate([x2, x1], axis=-1)
    rot = x[..., :rotary_dim] * c + rolled * s
    if rotary_dim < d:
        rot = jnp.concatenate([rot, x[..., rotary_dim:]], axis=-1)
    return rot


def _rope_split_kernel(qkv_ref, cos_ref, sin_ref, q_ref, k_ref, v_ref, *,
                       softmax_scale, rotary_dim):
    # qkv_ref: (ts, 3, th, d); cos/sin_ref: (ts, rd) full-width f32 tables, sign folded into sin.
    qkv = qkv_ref[...]
    q = qkv[:, 0].astype(jnp.float32)                      # (ts, th, d)
    k = qkv[:, 1].astype(jnp.float32)
    v = qkv[:, 2]

    if rotary_dim > 0:
        c = cos_ref[...][:, None, :]                       # (ts, 1, rd)
        s = sin_ref[...][:, None, :]
        q = _rotate_half(q, c, s, rotary_dim)
        k = _rotate_half(k, c, s, rotary_dim)

    q = q * softmax_scale                                  # fold softmax scale into q once

    # One head-major transpose per token (amortized over the whole KV sweep in attention).
    q_ref[...] = q.transpose(1, 0, 2).astype(q_ref.dtype)
    k_ref[...] = k.transpose(1, 0, 2).astype(k_ref.dtype)
    v_ref[...] = v.transpose(1, 0, 2).astype(v_ref.dtype)


def rope_tables(seqlen, rotary_dim, base):
    """Full-width rotate-half tables kept in f32; sign folded into sin: sin_f = [-sin, sin]."""
    if rotary_dim == 0:
        z = jnp.zeros((seqlen, 1), jnp.float32)
        return z, z
    inv_freq = 1.0 / (base ** (jnp.arange(0, rotary_dim, 2, dtype=jnp.float32) / rotary_dim))
    t = jnp.arange(seqlen, dtype=jnp.float32)
    freqs = jnp.outer(t, inv_freq)                          # (s, rd/2)
    cos, sin = jnp.cos(freqs), jnp.sin(freqs)
    cos_f = jnp.concatenate([cos, cos], axis=-1)            # (s, rd)
    sin_f = jnp.concatenate([-sin, sin], axis=-1)           # (s, rd)
    return cos_f, sin_f


def rope_split_pallas(qkv, *, softmax_scale, rotary_dim, rope_base, out_dtype):
    """(b, s, 3, h, d) -> (q, k, v) head-major (b, h, s, d), RoPE + scale applied once."""
    b, s, three, h, d = qkv.shape
    assert three == 3
    cos_f, sin_f = rope_tables(s, rotary_dim, rope_base)
    rd = cos_f.shape[-1]

    ts = _pick_tile(s, (128, 64, 32, 16, 8))
    th = 8 if h % 8 == 0 else h

    kern = functools.partial(_rope_split_kernel, softmax_scale=softmax_scale,
                             rotary_dim=rotary_dim)
    out_sds = jax.ShapeDtypeStruct((b, h, s, d), out_dtype)
    hm_spec = pl.BlockSpec((None, th, ts, d), lambda bb, hb, sb: (bb, hb, sb, 0))

    return pl.pallas_call(
        kern,
        out_shape=(out_sds, out_sds, out_sds),
        grid_spec=pltpu.PrefetchScalarGridSpec(
            num_scalar_prefetch=0,
            grid=(b, h // th, s // ts),
            in_specs=[
                pl.BlockSpec((None, ts, 3, th, d), lambda bb, hb, sb: (bb, sb, 0, hb, 0)),
                pl.BlockSpec((ts, rd), lambda bb, hb, sb: (sb, 0)),
                pl.BlockSpec((ts, rd), lambda bb, hb, sb: (sb, 0)),
            ],
            out_specs=[hm_spec, hm_spec, hm_spec],
        ),
        compiler_params=pltpu.CompilerParams(
            dimension_semantics=("parallel", "parallel", "parallel"),
            vmem_limit_bytes=_VMEM_LIMIT),
    )(qkv, cos_f, sin_f)


# ----------------------------------------------------------------------------
# Pallas kernel 3: flash-style self-attention on head-major q/k/v.
#   grid (B, H/th, S/tq, S/tk); kv axis last + "arbitrary"; online softmax with
#   lane-replicated m/l scratch and f32 acc; causal blocks above the diagonal
#   skip BOTH compute (pl.when) and K/V DMA (index maps clamped at the diagonal);
#   tiles arrive head-major so the inner loop has no transposes; q is already
#   RoPE'd and pre-scaled by the prepass.
# ----------------------------------------------------------------------------
def _flash_attn_kernel(q_ref, k_ref, v_ref, o_ref, m_ref, l_ref, acc_ref, *, causal):
    qi = pl.program_id(2)
    ki = pl.program_id(3)

    @pl.when(ki == 0)
    def _init():
        m_ref[...] = jnp.full_like(m_ref, -jnp.inf)
        l_ref[...] = jnp.zeros_like(l_ref)
        acc_ref[...] = jnp.zeros_like(acc_ref)

    def _block(masked):
        q = q_ref[...]                                    # (th, tq, d) RoPE'd, pre-scaled
        k = k_ref[...]                                    # (th, tk, d)
        s = jnp.einsum("hqd,hkd->hqk", q, k,
                       preferred_element_type=jnp.float32)
        tq, tk = s.shape[1], s.shape[2]
        if masked:
            # Diagonal block only (qi == ki, tq == tk): 2-D iota mask broadcast over heads.
            # -10000.0 matches InternLM / flash_attn SelfAttention.
            row = lax.broadcasted_iota(jnp.int32, (tq, tk), 0)
            col = lax.broadcasted_iota(jnp.int32, (tq, tk), 1)
            s = jnp.where((col <= row)[None, :, :], s, -10000.0)

        m_prev = m_ref[...]                               # (th, tq, LANES) lane-replicated
        m_new = jnp.maximum(m_prev, jnp.max(s, axis=-1, keepdims=True))
        alpha = jnp.exp(m_prev - m_new)
        p = jnp.exp(s - _lane_match(m_new, tk))
        l_ref[...] = alpha * l_ref[...] + jnp.sum(p, axis=-1, keepdims=True)
        v = v_ref[...]
        acc_ref[...] = _lane_match(alpha, v.shape[-1]) * acc_ref[...] + jnp.einsum(
            "hqk,hkd->hqd", p.astype(v.dtype), v,
            preferred_element_type=jnp.float32)
        m_ref[...] = m_new

    if causal:
        @pl.when(ki < qi)           # below diagonal: no mask needed
        def _body():
            _block(masked=False)

        @pl.when(ki == qi)          # diagonal block: apply triangular mask
        def _diag():
            _block(masked=True)
        # ki > qi: compute skipped (pl.when) and K/V DMA skipped (clamped index map).
        last_k = qi
    else:
        _block(masked=False)
        last_k = pl.num_programs(3) - 1

    @pl.when(ki == last_k)
    def _finalize():
        inv_l = pl.reciprocal(l_ref[...], approx=False)
        out = acc_ref[...] * _lane_match(inv_l, acc_ref.shape[-1])
        # One transpose per q block (amortized over the whole KV sweep).
        o_ref[...] = out.transpose(1, 0, 2).astype(o_ref.dtype)


def attention_pallas(q, k, v, *, causal, out_dtype, block_q=None):
    """q/k/v: head-major (b, h, s, d); q already RoPE'd and pre-scaled. Returns (b, s, h, d)."""
    b, h, s, d = q.shape
    if block_q is None:
        block_q = _pick_tile(s, (256, 128))   # cap at 256 keeps the working set v7x-friendly
    tq = tk = block_q                         # tq == tk required (diag mask + clamped kv map)
    assert s % tq == 0 and (tq % 8 == 0 or tq == s)
    th = 8 if h % 8 == 0 else h
    assert h % th == 0

    if causal:
        # Clamp the K/V block index at the diagonal: fully-masked blocks (kb > qb) revisit the
        # same block index, so Pallas skips their HBM->VMEM DMA (~2x less K/V traffic).
        kv_index = lambda bb, hb, qb, kb: (bb, hb, jnp.minimum(kb, qb), 0)
    else:
        kv_index = lambda bb, hb, qb, kb: (bb, hb, kb, 0)

    kern = functools.partial(_flash_attn_kernel, causal=causal)

    return pl.pallas_call(
        kern,
        out_shape=jax.ShapeDtypeStruct((b, s, h, d), out_dtype),
        grid_spec=pltpu.PrefetchScalarGridSpec(
            num_scalar_prefetch=0,
            grid=(b, h // th, s // tq, s // tk),
            in_specs=[
                pl.BlockSpec((None, th, tq, d), lambda bb, hb, qb, kb: (bb, hb, qb, 0)),
                pl.BlockSpec((None, th, tk, d), kv_index),
                pl.BlockSpec((None, th, tk, d), kv_index),
            ],
            out_specs=pl.BlockSpec((None, tq, th, d),
                                   lambda bb, hb, qb, kb: (bb, qb, hb, 0)),
            scratch_shapes=[
                pltpu.VMEM((th, tq, LANES), jnp.float32),   # m (lane-replicated running max)
                pltpu.VMEM((th, tq, LANES), jnp.float32),   # l (lane-replicated running sum)
                pltpu.VMEM((th, tq, d), jnp.float32),       # acc
            ],
        ),
        compiler_params=pltpu.CompilerParams(
            # b * (h//th) * (s//tq) parallel units keep both v7x TensorCores busy.
            dimension_semantics=("parallel", "parallel", "parallel", "arbitrary"),
            vmem_limit_bytes=_VMEM_LIMIT),
    )(q, k, v)


# ----------------------------------------------------------------------------
# MHA forward
# ----------------------------------------------------------------------------
def mha_forward(x, params, *, num_heads, causal=True, softmax_scale=None,
                rotary_emb_dim=0, rope_base=10000, attn_block_q=None,
                attn_bf16=False):
    b, s, e = x.shape
    head_dim = e // num_heads
    if softmax_scale is None:
        softmax_scale = 1.0 / math.sqrt(head_dim)

    # Wqkv projection (tiled Pallas GEMM).
    qkv = linear_pallas(x.reshape(b * s, e), params["wqkv_w"], params["wqkv_b"])
    qkv = qkv.reshape(b, s, 3, num_heads, head_dim)

    # One-shot prepass: RoPE(q, k), softmax_scale folded into q, head-major split.
    # attn_bf16 mirrors the torch module's autocast-to-bf16 flash branch (f32 model dtype).
    attn_dtype = jnp.bfloat16 if attn_bf16 else x.dtype
    q, k, v = rope_split_pallas(qkv, softmax_scale=softmax_scale,
                                rotary_dim=rotary_emb_dim, rope_base=rope_base,
                                out_dtype=attn_dtype)

    # Flash attention; reads head-major (b,h,s,d), writes (b,s,h,d) in x dtype.
    ctx = attention_pallas(q, k, v, causal=causal, out_dtype=x.dtype,
                           block_q=attn_block_q)

    # (b, s, h, d) -> (b*s, h*d): contiguous merge, no transpose / HBM round trip.
    out = linear_pallas(ctx.reshape(b * s, e), params["out_w"], params["out_b"])
    return out.reshape(b, s, e)


# ----------------------------------------------------------------------------
# Pure-JAX reference (for correctness check)
# ----------------------------------------------------------------------------
def rope_cos_sin(seqlen, rotary_dim, base):
    inv_freq = 1.0 / (base ** (jnp.arange(0, rotary_dim, 2, dtype=jnp.float32) / rotary_dim))
    t = jnp.arange(seqlen, dtype=jnp.float32)
    freqs = jnp.outer(t, inv_freq)                       # (s, rotary_dim/2)
    return jnp.cos(freqs), jnp.sin(freqs)


def apply_rotary(x, cos, sin):
    """Reference-side RoPE. x: (b, s, h, d); rotate first 2*cos.shape[-1] dims."""
    r = cos.shape[-1] * 2
    x_rot, x_pass = x[..., :r], x[..., r:]
    x1, x2 = x_rot[..., : r // 2], x_rot[..., r // 2:]
    c = cos[None, :, None, :]
    s = sin[None, :, None, :]
    rotated = jnp.concatenate([x1 * c - x2 * s, x1 * s + x2 * c], axis=-1)
    return jnp.concatenate([rotated, x_pass], axis=-1)


def mha_reference(x, params, *, num_heads, causal=True, softmax_scale=None,
                  rotary_emb_dim=0, rope_base=10000):
    b, s, e = x.shape
    head_dim = e // num_heads
    if softmax_scale is None:
        softmax_scale = 1.0 / math.sqrt(head_dim)
    qkv = x.reshape(b * s, e) @ params["wqkv_w"] + params["wqkv_b"][0]
    qkv = qkv.reshape(b, s, 3, num_heads, head_dim)
    if rotary_emb_dim > 0:
        cos, sin = rope_cos_sin(s, rotary_emb_dim, rope_base)
        q = apply_rotary(qkv[:, :, 0], cos, sin)
        k = apply_rotary(qkv[:, :, 1], cos, sin)
    else:
        q, k = qkv[:, :, 0], qkv[:, :, 1]
    v = qkv[:, :, 2]
    scores = jnp.einsum("bshd,bthd->bhst", q, k) * softmax_scale
    if causal:
        mask = jnp.tril(jnp.ones((s, s), dtype=bool))
        scores = jnp.where(mask[None, None], scores, -10000.0)
    p = jax.nn.softmax(scores, axis=-1)
    ctx = jnp.einsum("bhst,bthd->bshd", p, v).reshape(b * s, e)
    out = ctx @ params["out_w"] + params["out_b"][0]
    return out.reshape(b, s, e)


if __name__ == "__main__":
    # Small, module-consistent shapes; seqlen=32 with attn block 8 exercises the
    # multi-block online-softmax, causal block/DMA skipping, and prepass paths.
    batch, seqlen = 2, 32
    embed_dim, num_heads = 32, 4
    head_dim = embed_dim // num_heads          # 8
    rotary_emb_dim = head_dim                  # typical InternLM config
    causal = True

    key = jax.random.PRNGKey(0)
    kx, k1, k2, k3, k4 = jax.random.split(key, 5)

    x = jax.random.normal(kx, (batch, seqlen, embed_dim), dtype=jnp.float32)

    params = {
        # Wqkv: torch Linear(embed_dim, 3*embed_dim, bias=True) -> stored transposed
        "wqkv_w": (jax.random.normal(k1, (embed_dim, 3 * embed_dim), jnp.float32) * 0.02),
        "wqkv_b": (jax.random.normal(k2, (1, 3 * embed_dim), jnp.float32) * 0.02),
        # out_proj: torch Linear(embed_dim, embed_dim, bias=True)
        "out_w": (jax.random.normal(k3, (embed_dim, embed_dim), jnp.float32) * 0.02),
        "out_b": (jax.random.normal(k4, (1, embed_dim), jnp.float32) * 0.02),
    }

    ref = mha_reference(x, params, num_heads=num_heads, causal=causal,
                        rotary_emb_dim=rotary_emb_dim)

    # Exact-dtype path (f32 MXU operands) -- tight tolerance vs. the f32 reference.
    out = mha_forward(x, params, num_heads=num_heads, causal=causal,
                      rotary_emb_dim=rotary_emb_dim, attn_block_q=8, attn_bf16=False)
    out = jax.block_until_ready(out)
    assert out.shape == (batch, seqlen, embed_dim)
    assert jnp.allclose(out, ref, atol=1e-4, rtol=1e-4), "f32 path mismatch vs. reference"

    # bf16-MXU attention path (matches the torch module's autocast-to-bf16 flash branch;
    # recommended on v6e/v7x) -- looser tolerance vs. the f32 reference.
    out_bf16 = mha_forward(x, params, num_heads=num_heads, causal=causal,
                           rotary_emb_dim=rotary_emb_dim, attn_block_q=8, attn_bf16=True)
    out_bf16 = jax.block_until_ready(out_bf16)
    assert jnp.allclose(out_bf16, ref, atol=3e-2, rtol=3e-2), "bf16 path mismatch vs. reference"

    print("KERNEL_OK")
</pallas_src>

<mosaic_0001>
module attributes {stable_mosaic.version = 11 : i64} {
  func.func @_linear_kernel(%arg0: i32, %arg1: i32, %arg2: i32, %arg3: memref<64x32xf32, #tpu.memory_space<vmem>>, %arg4: memref<32x96xf32, #tpu.memory_space<vmem>>, %arg5: memref<1x96xf32, #tpu.memory_space<vmem>>, %arg6: memref<64x96xf32, #tpu.memory_space<vmem>>, %arg7: memref<64x96xf32, #tpu.memory_space<vmem>>) attributes {dimension_semantics = [#tpu.dimension_semantics<parallel>, #tpu.dimension_semantics<parallel>, #tpu.dimension_semantics<arbitrary>], iteration_bounds = array<i64: 1, 1, 1>, scalar_prefetch = 0 : i64, scratch_operands = 1 : i64, tpu.core_type = #tpu.core_type<tc>, window_params = [{transform_indices = @transform_0, window_bounds = array<i64: 64, 32>}, {transform_indices = @transform_1, window_bounds = array<i64: 32, 96>}, {transform_indices = @transform_2, window_bounds = array<i64: 1, 96>}, {transform_indices = @transform_3, window_bounds = array<i64: 64, 96>}]} {
    %c0_i32 = arith.constant 0 : i32
    %0 = arith.cmpi eq, %arg2, %c0_i32 : i32
    %1 = arith.extui %0 : i1 to i32
    %c0_i32_0 = arith.constant 0 : i32
    %2 = arith.cmpi ne, %1, %c0_i32_0 : i32
    scf.if %2 {
      %c0_10 = arith.constant 0 : index
      %c0_11 = arith.constant 0 : index
      %12 = vector.load %arg5[%c0_10, %c0_11] : memref<1x96xf32, #tpu.memory_space<vmem>>, vector<1x96xf32>
      %13 = vector.shape_cast %12 : vector<1x96xf32> to vector<1x96xf32>
      %14 = vector.broadcast %13 : vector<1x96xf32> to vector<64x96xf32>
      %c0_12 = arith.constant 0 : index
      %c0_13 = arith.constant 0 : index
      %15 = vector.load %arg7[%c0_12, %c0_13] : memref<64x96xf32, #tpu.memory_space<vmem>>, vector<64x96xf32>
      tpu.vector_store %arg7[%c0_12, %c0_13], %14 {strides = array<i32>} : memref<64x96xf32, #tpu.memory_space<vmem>>, vector<64x96xf32>,
    } else {
    }
    %c0 = arith.constant 0 : index
    %c0_1 = arith.constant 0 : index
    %3 = vector.load %arg7[%c0, %c0_1] : memref<64x96xf32, #tpu.memory_space<vmem>>, vector<64x96xf32>
    %c0_2 = arith.constant 0 : index
    %c0_3 = arith.constant 0 : index
    %4 = vector.load %arg3[%c0_2, %c0_3] : memref<64x32xf32, #tpu.memory_space<vmem>>, vector<64x32xf32>
    %c0_4 = arith.constant 0 : index
    %c0_5 = arith.constant 0 : index
    %5 = vector.load %arg4[%c0_4, %c0_5] : memref<32x96xf32, #tpu.memory_space<vmem>>, vector<32x96xf32>
    %cst = arith.constant dense<0.000000e+00> : vector<64x96xf32>
    %6 = tpu.matmul %4, %5, %cst {dimension_numbers = #tpu.dot_dimension_numbers<[1], [0], [0], [1], [0, 0, 1, 1], [], []>} : vector<64x32xf32>, vector<32x96xf32>, vector<64x96xf32> -> vector<64x96xf32>
    %7 = arith.addf %3, %6 : vector<64x96xf32>
    %c0_6 = arith.constant 0 : index
    %c0_7 = arith.constant 0 : index
    %8 = vector.load %arg7[%c0_6, %c0_7] : memref<64x96xf32, #tpu.memory_space<vmem>>, vector<64x96xf32>
    tpu.vector_store %arg7[%c0_6, %c0_7], %7 {strides = array<i32>} : memref<64x96xf32, #tpu.memory_space<vmem>>, vector<64x96xf32>,
    %c0_i32_8 = arith.constant 0 : i32
    %9 = arith.cmpi eq, %arg2, %c0_i32_8 : i32
    %10 = arith.extui %9 : i1 to i32
    %c0_i32_9 = arith.constant 0 : i32
    %11 = arith.cmpi ne, %10, %c0_i32_9 : i32
    scf.if %11 {
      %c0_10 = arith.constant 0 : index
      %c0_11 = arith.constant 0 : index
      %12 = vector.load %arg7[%c0_10, %c0_11] : memref<64x96xf32, #tpu.memory_space<vmem>>, vector<64x96xf32>
      %c0_12 = arith.constant 0 : index
      %c0_13 = arith.constant 0 : index
      %13 = vector.load %arg6[%c0_12, %c0_13] : memref<64x96xf32, #tpu.memory_space<vmem>>, vector<64x96xf32>
      tpu.vector_store %arg6[%c0_12, %c0_13], %12 {strides = array<i32>} : memref<64x96xf32, #tpu.memory_space<vmem>>, vector<64x96xf32>,
    } else {
    }
    return
  }
  func.func @transform_0(%arg0: i32, %arg1: i32, %arg2: i32) -> (i32, i32) {
    %c0_i32 = arith.constant 0 : i32
    return %arg0, %arg2 : i32, i32
  }
  func.func @transform_1(%arg0: i32, %arg1: i32, %arg2: i32) -> (i32, i32) {
    %c0_i32 = arith.constant 0 : i32
    return %arg2, %arg1 : i32, i32
  }
  func.func @transform_2(%arg0: i32, %arg1: i32, %arg2: i32) -> (i32, i32) {
    %c0_i32 = arith.constant 0 : i32
    %c0_i32_0 = arith.constant 0 : i32
    return %c0_i32, %arg1 : i32, i32
  }
  func.func @transform_3(%arg0: i32, %arg1: i32, %arg2: i32) -> (i32, i32) {
    %c0_i32 = arith.constant 0 : i32
    return %arg0, %arg1 : i32, i32
  }
}

</mosaic_0001>

<bundles_post_ra>
// kernel: tpu_custom_call.1
= control target key start
LH: loop header
LB: loop body
LE: loop exit
PB: predicated region body
PF: predicated region fallthrough
CT: control target
= control target key end

     0   :  { %vm26_vm0 = vcmask 785408   ;;  %s408_s0 = inlined_call_operand.vmem [shape: f32[64,32], index: 0, kind: input, shape index: {}]   ;;  %s409_s1 = inlined_call_operand.vmem [shape: f32[32,96], index: 1, kind: input, shape index: {}]   ;;  %s410_s2 = inlined_call_operand.vmem [shape: f32[1,96], index: 2, kind: input, shape index: {}]   ;;  %s411_s3 = inlined_call_operand.hbm [shape: f32[64,96], index: 3, kind: output, shape index: {}]  }
   0x1   :  { %v54_v0 = vld [vmem:[%s409_s1 + $0x18] sm:$0xff]  ;;  %v53_v1 = vld [vmem:[%s409_s1 + $0x10] sm:$0xff]  ;;  %v52_v2 = vld [vmem:[%s409_s1 + $0x8] sm:$0xff] }
   0x2   :  { %258 = vmatprep.subr.mxu0 %v54_v0  ;;  %278 = vmatprep.subr.mxu1 %v54_v0  ;;  %v51_v3 = vld [vmem:[%s409_s1] sm:$0xff] }
   0x3   :  { %259 = vmatpush3.msra.mxu0 %v54_v0  ;;  %282 = vmatpush3.msra.mxu1 %v54_v0  ;;  %v237_v4 = vld [vmem:[%s410_s2] ss:$0 sm:$0xff] }
   0x4   :  { %260 = vmatprep.subr.mxu0 %v53_v1  ;;  %279 = vmatprep.subr.mxu1 %v53_v1 }
   0x5   :  { %261 = vmatpush3.msra.mxu0 %v53_v1  ;;  %283 = vmatpush3.msra.mxu1 %v53_v1 }
   0x6   :  { %8 = vsyncpa [#allocation4], 0  ;;  %262 = vmatprep.subr.mxu0 %v52_v2  ;;  %280 = vmatprep.subr.mxu1 %v52_v2  ;;  %28 = vst.msk [vmem:[#allocation2 + $0x8] sm:$0xff] %vm26_vm0, %v237_v4  ;;  %v43_v5 = vld [vmem:[%s408_s0] sm:$0xff]  ;;  %vm55_vm1 = vcmask 261120   ;;  %v44_v7 = vld [vmem:[%s408_s0 + $0x8] sm:$0xff] }
   0x7   :  { %27 = vst.msk [vmem:[#allocation2] sm:$0xff] %vm26_vm0, %v237_v4  ;;  %29 = vst.msk [vmem:[#allocation2 + $0x10] sm:$0xff] %vm26_vm0, %v237_v4  ;;  %263 = vmatpush3.msra.mxu0 %v52_v2  ;;  %284 = vmatpush3.msra.mxu1 %v52_v2  ;;  %v47_v6 = vld [vmem:[%s408_s0 + $0x20] sm:$0xff]  ;;  %v48_v8 = vld [vmem:[%s408_s0 + $0x28] sm:$0xff] }
   0x8   :  { %30 = vst.msk [vmem:[#allocation2 + $0x18] sm:$0xff] %vm26_vm0, %v237_v4  ;;  %31 = vst.msk [vmem:[#allocation2 + $0x20] sm:$0xff] %vm26_vm0, %v237_v4  ;;  %264 = vmatprep.subr.mxu0 %v51_v3  ;;  %281 = vmatprep.subr.mxu1 %v51_v3  ;;  %v45_v9 = vld [vmem:[%s408_s0 + $0x10] sm:$0xff]  ;;  %v46_v11 = vld [vmem:[%s408_s0 + $0x18] sm:$0xff] }
   0x9   :  { %32 = vst.msk [vmem:[#allocation2 + $0x28] sm:$0xff] %vm26_vm0, %v237_v4  ;;  %33 = vst.msk [vmem:[#allocation2 + $0x30] sm:$0xff] %vm26_vm0, %v237_v4  ;;  %265 = vmatpush3.msra.mxu0 %v51_v3  ;;  %285 = vmatpush3.msra.mxu1 %v51_v3  ;;  %v49_v10 = vld [vmem:[%s408_s0 + $0x30] sm:$0xff]  ;;  %v50_v12 = vld [vmem:[%s408_s0 + $0x38] sm:$0xff]  ;;  %s311_s0 = smov [#allocation3]  }
   0xa   :  { %34 = vst.msk [vmem:[#allocation2 + $0x38] sm:$0xff] %vm26_vm0, %v237_v4  ;;  %266 = vmatprep.mubr.msk.f32.mxu0 %vm55_vm1, %v43_v5  ;;  %272 = vmatprep.mubr.msk.f32.mxu1 %vm55_vm1, %v47_v6  ;;  %s226_s9 = sshll.u32 %s311_s0, 4  ;;  %s227_s9 = int_to_ptr.vmem [resolvable:$true] %s226_s9 }
   0xb   :  { %267 = vmatmul.mubr.msk.f32.vlgmr.msra.gmra.mxu0 %vm55_vm1, %v44_v7  ;;  %273 = vmatmul.mubr.msk.f32.vlgmr.msra.gmra.mxu1 %vm55_vm1, %v48_v8  ;;  %s289_s10 = scalar_lea.vmem %s227_s9, 1024  ;;  %p294_p1 = scmp.lt.s32.totalorder %s227_s9, %s227_s9 }
   0xc   :  { %269 = vmatprep.mubr.msk.f32.mxu0 %vm55_vm1, %v45_v9  ;;  %275 = vmatprep.mubr.msk.f32.mxu1 %vm55_vm1, %v49_v10  ;;  %p290_p0 = scmp.ne.s32.totalorder %s227_s9, %s289_s10  ;;  %p295_p2 = scmp.lt.s32.totalorder %s289_s10, %s289_s10 }
   0xd   :  { %v36_v13 = vld [vmem:[#allocation2 + $0x8] sm:$0xff] }
   0xe   :  { %v35_v17 = vld [vmem:[#allocation2] sm:$0xff]  ;;  %v37_v29 = vld [vmem:[#allocation2 + $0x10] sm:$0xff]  ;;  %p296_p3 = por %p295_p2, %p294_p1 }
   0xf   :  { %270 = vmatmul.mubr.msk.f32.gmra.mxu0 %vm55_vm1, %v46_v11  ;;  %276 = vmatmul.mubr.msk.f32.gmra.mxu1 %vm55_vm1, %v50_v12  ;;  %v39_v18 = vld [vmem:[#allocation2 + $0x20] sm:$0xff]  ;;  %v38_v23 = vld [vmem:[#allocation2 + $0x18] sm:$0xff] }
  0x10   :  { %v40_v14 = vld [vmem:[#allocation2 + $0x28] sm:$0xff]  ;;  %v41_v30 = vld [vmem:[#allocation2 + $0x30] sm:$0xff]  ;;  %p297_p4 = pnand %p296_p3, %p290_p0 }
  0x11   :  { %v42_v24 = vld [vmem:[#allocation2 + $0x38] sm:$0xff] }
  0xcb   :  { %v268_v15 = vpop.f32.mrf.mxu0  ;;  %v274_v16 = vpop.f32.mrf.mxu1 }
  0xcc   :  { %v186_v19 = vadd.f32 %v268_v15, %v36_v13  ;;  %v190_v20 = vadd.f32 %v274_v16, %v40_v14 }
  0xcd   :  { %v146_v21 = vpop.f32.mrf.mxu0  ;;  %v166_v22 = vpop.f32.mrf.mxu1 }
  0xce   :  { %195 = vst.msk [vmem:[#allocation2 + $0x8] sm:$0xff] %vm26_vm0, %v186_v19  ;;  %199 = vst.msk [vmem:[#allocation2 + $0x28] sm:$0xff] %vm26_vm0, %v190_v20  ;;  %v185_v25 = vadd.f32 %v146_v21, %v35_v17  ;;  %v189_v26 = vadd.f32 %v166_v22, %v39_v18 }
  0xcf   :  { %v271_v27 = vpop.f32.mrf.mxu0  ;;  %v277_v28 = vpop.f32.mrf.mxu1 }
  0xd0   :  { %194 = vst.msk [vmem:[#allocation2] sm:$0xff] %vm26_vm0, %v185_v25  ;;  %198 = vst.msk [vmem:[#allocation2 + $0x20] sm:$0xff] %vm26_vm0, %v189_v26  ;;  %v188_v31 = vadd.f32 %v271_v27, %v38_v23  ;;  %v192_v32 = vadd.f32 %v277_v28, %v42_v24 }
  0xd1   :  { %v156_v33 = vpop.f32.mrf.mxu0  ;;  %v176_v34 = vpop.f32.mrf.mxu1 }
  0xd2   :  { %197 = vst.msk [vmem:[#allocation2 + $0x18] sm:$0xff] %vm26_vm0, %v188_v31  ;;  %201 = vst.msk [vmem:[#allocation2 + $0x38] sm:$0xff] %vm26_vm0, %v192_v32  ;;  %v187_v35 = vadd.f32 %v156_v33, %v37_v29  ;;  %v191_v36 = vadd.f32 %v176_v34, %v41_v30 }
  0xd4   :  { %196 = vst.msk [vmem:[#allocation2 + $0x10] sm:$0xff] %vm26_vm0, %v187_v35  ;;  %200 = vst.msk [vmem:[#allocation2 + $0x30] sm:$0xff] %vm26_vm0, %v191_v36 }
  0xd5   :  { %v206_v37 = vld [vmem:[#allocation2 + $0x8] sm:$0xff] }
  0xd6   :  { %v210_v38 = vld [vmem:[#allocation2 + $0x28] sm:$0xff]  ;;  %214 = vst.msk [vmem:[#allocation3 + $0x8] sm:$0xff] %vm26_vm0, %v206_v37 }
  0xd7   :  { %218 = vst.msk [vmem:[#allocation3 + $0x28] sm:$0xff] %vm26_vm0, %v210_v38  ;;  %v205_v39 = vld [vmem:[#allocation2] sm:$0xff] }
  0xd8   :  { %v209_v40 = vld [vmem:[#allocation2 + $0x20] sm:$0xff]  ;;  %213 = vst.msk [vmem:[#allocation3] sm:$0xff] %vm26_vm0, %v205_v39 }
  0xd9   :  { %217 = vst.msk [vmem:[#allocation3 + $0x20] sm:$0xff] %vm26_vm0, %v209_v40  ;;  %v208_v41 = vld [vmem:[#allocation2 + $0x18] sm:$0xff] }
  0xda   :  { %v212_v42 = vld [vmem:[#allocation2 + $0x38] sm:$0xff]  ;;  %216 = vst.msk [vmem:[#allocation3 + $0x18] sm:$0xff] %vm26_vm0, %v208_v41 }
  0xdb   :  { %220 = vst.msk [vmem:[#allocation3 + $0x38] sm:$0xff] %vm26_vm0, %v212_v42  ;;  %v207_v43 = vld [vmem:[#allocation2 + $0x10] sm:$0xff] }
  0xdc   :  { %v211_v44 = vld [vmem:[#allocation2 + $0x30] sm:$0xff]  ;;  %215 = vst.msk [vmem:[#allocation3 + $0x10] sm:$0xff] %vm26_vm0, %v207_v43 }
  0xdd   :  { %219 = vst.msk [vmem:[#allocation3 + $0x30] sm:$0xff] %vm26_vm0, %v211_v44 }
  0xde   :  { %300 = shalt.err (!%p297_p4)
}
  0xdf   :  { %s312_s11 = smov 128   ;;  %s313_s12 = smov 8  }
  0xe0   :  { %232 = dma.vmem_to_hbm [thread:$0]  %s227_s9, 1024, %s411_s3, [#allocation4], %s312_s11, %s312_s11, %s313_s12  }
  0xe1   :  { %309 = dma.done.wait [#allocation4], 1024  }
  0xe2   :  { %310 = vsyncadd [#allocation4], 4294966272 }
  0xe3   :  { %236 = vsyncpa [#allocation4], 1 }

</bundles_post_ra>
